<compile_context>
chip_gen: v6e
topology: v6e:2x2x1
jax: 0.10.0
libtpu: 0.0.40
codegen_flags: <defaults>
</compile_context>

<pallas_src>
import functools

import jax
import jax.numpy as jnp
from jax.experimental import pallas as pl
from jax.experimental.pallas import tpu as pltpu

K_IN = 28 * 28   # 784
HIDDEN = 128
N_OUT = 10


def _round_up(x, m):
    return (x + m - 1) // m * m


def mlp_kernel(x_ref, w1_ref, b1_ref, w2_ref, b2_ref, o_ref):
    # x arrives as f32 straight from HBM; cast to bf16 on the VPU (hidden under
    # the mem-bound DMA), accumulate both matmuls in f32 on the MXU.
    x = x_ref[...].astype(jnp.bfloat16)                                 # (TB, 784) bf16
    h = jnp.dot(x, w1_ref[...], preferred_element_type=jnp.float32)     # (TB, 128) f32
    h = jnp.maximum(h + b1_ref[...], 0.0)                               # bias + ReLU (VPU)
    y = jnp.dot(h.astype(jnp.bfloat16), w2_ref[...],
                preferred_element_type=jnp.float32)                     # (TB, 10) f32
    o_ref[...] = y + b2_ref[...]                                        # f32 logits


def prepare_params(w1, b1, w2, b2):
    """One-time (hoisted out of the hot path) conversion of (in,out)-layout f32
    params to VMEM-resident bf16 weights + (1, N) f32 biases."""
    return (w1.astype(jnp.bfloat16),
            b1.astype(jnp.float32).reshape(1, HIDDEN),
            w2.astype(jnp.bfloat16),
            b2.astype(jnp.float32).reshape(1, N_OUT))


@functools.partial(jax.jit, static_argnames=("tile_b",))
def simple_nn_forward(x_nchw, w1_bf, b1_f, w2_bf, b2_f, *, tile_b=2048):
    """x_nchw: (B, 1, 28, 28) f32. Returns (B, 10) f32 logits.

    w1_bf: (784, 128) bf16, b1_f: (1, 128) f32, w2_bf: (128, 10) bf16,
    b2_f: (1, 10) f32  (use prepare_params()).
    """
    B = x_nchw.shape[0]
    x_flat = x_nchw.reshape(B, K_IN).astype(jnp.float32)   # torch x.view(B, -1); no extra copy

    # Tile choice: >=2 grid steps when the batch allows it (megacore sharding on
    # v7x), and batch padding bounded by one (small) tile.
    tb = max(8, min(int(tile_b), _round_up(pl.cdiv(B, 2), 8)))
    b_pad = _round_up(B, tb)
    if b_pad != B:
        x_flat = jnp.pad(x_flat, ((0, b_pad - B), (0, 0)))   # only pad materialized, zeros => exact
    grid = (b_pad // tb,)

    # Scoped-VMEM request sized to the real working set (x/out double buffers +
    # in-kernel intermediates + resident weights), kept under v7x's 64 MiB/TC.
    vmem_bytes = (2 * tb * K_IN * 4               # x f32, double-buffered
                  + 2 * tb * HIDDEN * 4           # out (lane-padded) f32, double-buffered
                  + tb * (K_IN * 2 + HIDDEN * 6)  # bf16 x, f32 h, bf16 h intermediates
                  + (2 << 20))                    # resident weights/biases + slack
    vmem_limit = min(max(_round_up(vmem_bytes, 1 << 20), 32 << 20), 56 << 20)

    cost = pl.CostEstimate(
        flops=2 * b_pad * (K_IN * HIDDEN + HIDDEN * N_OUT),
        bytes_accessed=(b_pad * K_IN * 4 + K_IN * HIDDEN * 2
                        + HIDDEN * N_OUT * 2 + b_pad * N_OUT * 4),
        transcendentals=0,
    )

    out = pl.pallas_call(
        mlp_kernel,
        out_shape=jax.ShapeDtypeStruct((b_pad, N_OUT), jnp.float32),
        grid_spec=pltpu.PrefetchScalarGridSpec(
            num_scalar_prefetch=0,
            grid=grid,
            in_specs=[
                pl.BlockSpec((tb, K_IN), lambda i: (i, 0)),       # x: f32, streamed / double-buffered
                pl.BlockSpec((K_IN, HIDDEN), lambda i: (0, 0)),   # w1 bf16: resident
                pl.BlockSpec((1, HIDDEN), lambda i: (0, 0)),      # b1 f32: resident
                pl.BlockSpec((HIDDEN, N_OUT), lambda i: (0, 0)),  # w2 bf16: resident
                pl.BlockSpec((1, N_OUT), lambda i: (0, 0)),       # b2 f32: resident
            ],
            out_specs=pl.BlockSpec((tb, N_OUT), lambda i: (i, 0)),
        ),
        compiler_params=pltpu.CompilerParams(
            dimension_semantics=("parallel",),   # shard batch tiles across both TCs on v7x
            vmem_limit_bytes=vmem_limit,
        ),
        cost_estimate=cost,
    )(x_flat, w1_bf, b1_f, w2_bf, b2_f)

    return out[:B]


def init_params(key):
    """Deterministic init matching nn.Linear shapes (uniform +-1/sqrt(fan_in))."""
    k1, k2, k3, k4 = jax.random.split(key, 4)
    bound1 = 1.0 / jnp.sqrt(784.0)
    bound2 = 1.0 / jnp.sqrt(128.0)
    # stored as (in, out) == transpose of PyTorch's (out, in)
    w1 = jax.random.uniform(k1, (K_IN, HIDDEN), jnp.float32, -bound1, bound1)
    b1 = jax.random.uniform(k2, (HIDDEN,), jnp.float32, -bound1, bound1)
    w2 = jax.random.uniform(k3, (HIDDEN, N_OUT), jnp.float32, -bound2, bound2)
    b2 = jax.random.uniform(k4, (N_OUT,), jnp.float32, -bound2, bound2)
    return w1, b1, w2, b2


if __name__ == "__main__":
    key = jax.random.PRNGKey(0)
    k_x, k_p = jax.random.split(key)

    B = 2
    x = jax.random.normal(k_x, (B, 1, 28, 28), jnp.float32)   # NCHW like PyTorch
    w1, b1, w2, b2 = init_params(k_p)
    params = prepare_params(w1, b1, w2, b2)   # one-time bf16 conversion, hoisted off the hot path

    out = simple_nn_forward(x, *params)
    out = jax.block_until_ready(out)
    assert out.shape == (B, N_OUT)

    # Reference with the same bf16 quantization of x / weights, f32 accumulation.
    xb = x.reshape(B, -1).astype(jnp.bfloat16)
    h_ref = jnp.maximum(
        jnp.dot(xb, w1.astype(jnp.bfloat16), preferred_element_type=jnp.float32) + b1, 0.0)
    ref = jnp.dot(h_ref.astype(jnp.bfloat16), w2.astype(jnp.bfloat16),
                  preferred_element_type=jnp.float32) + b2
    assert jnp.allclose(out, ref, atol=1e-2, rtol=1e-2), (out, ref)

    # Loose check against the exact f32 PyTorch-equivalent forward.
    ref_f32 = jnp.maximum(x.reshape(B, -1) @ w1 + b1, 0.0) @ w2 + b2
    assert jnp.allclose(out, ref_f32, atol=5e-2, rtol=5e-2), (out, ref_f32)

    print("KERNEL_OK")
</pallas_src>

<mosaic_0001>
module attributes {stable_mosaic.version = 11 : i64} {
  func.func @mlp_kernel(%arg0: i32, %arg1: memref<8x784xf32, #tpu.memory_space<vmem>>, %arg2: memref<784x128xbf16, #tpu.memory_space<vmem>>, %arg3: memref<1x128xf32, #tpu.memory_space<vmem>>, %arg4: memref<128x10xbf16, #tpu.memory_space<vmem>>, %arg5: memref<1x10xf32, #tpu.memory_space<vmem>>, %arg6: memref<8x10xf32, #tpu.memory_space<vmem>>) attributes {dimension_semantics = [#tpu.dimension_semantics<parallel>], iteration_bounds = array<i64: 1>, scalar_prefetch = 0 : i64, scratch_operands = 0 : i64, tpu.core_type = #tpu.core_type<tc>, window_params = [{transform_indices = @transform_0, window_bounds = array<i64: 8, 784>}, {pipeline_mode = #tpu.pipeline_mode<synchronous>, transform_indices = @transform_1, window_bounds = array<i64: 784, 128>}, {pipeline_mode = #tpu.pipeline_mode<synchronous>, transform_indices = @transform_2, window_bounds = array<i64: 1, 128>}, {pipeline_mode = #tpu.pipeline_mode<synchronous>, transform_indices = @transform_3, window_bounds = array<i64: 128, 10>}, {pipeline_mode = #tpu.pipeline_mode<synchronous>, transform_indices = @transform_4, window_bounds = array<i64: 1, 10>}, {transform_indices = @transform_5, window_bounds = array<i64: 8, 10>}]} {
    %c0 = arith.constant 0 : index
    %c0_0 = arith.constant 0 : index
    %0 = vector.load %arg1[%c0, %c0_0] : memref<8x784xf32, #tpu.memory_space<vmem>>, vector<8x784xf32>
    %1 = arith.truncf %0 : vector<8x784xf32> to vector<8x784xbf16>
    %c0_1 = arith.constant 0 : index
    %c0_2 = arith.constant 0 : index
    %2 = vector.load %arg2[%c0_1, %c0_2] : memref<784x128xbf16, #tpu.memory_space<vmem>>, vector<784x128xbf16>
    %cst = arith.constant dense<0.000000e+00> : vector<8x128xf32>
    %3 = tpu.matmul %1, %2, %cst {dimension_numbers = #tpu.dot_dimension_numbers<[1], [0], [0], [1], [0, 0, 1, 1], [], []>} : vector<8x784xbf16>, vector<784x128xbf16>, vector<8x128xf32> -> vector<8x128xf32>
    %c0_3 = arith.constant 0 : index
    %c0_4 = arith.constant 0 : index
    %4 = vector.load %arg3[%c0_3, %c0_4] : memref<1x128xf32, #tpu.memory_space<vmem>>, vector<1x128xf32>
    %5 = vector.broadcast %4 : vector<1x128xf32> to vector<8x128xf32>
    %6 = arith.addf %3, %5 : vector<8x128xf32>
    %cst_5 = arith.constant 0.000000e+00 : f32
    %7 = vector.broadcast %cst_5 : f32 to vector<8x128xf32>
    %8 = arith.maximumf %6, %7 : vector<8x128xf32>
    %9 = arith.truncf %8 : vector<8x128xf32> to vector<8x128xbf16>
    %c0_6 = arith.constant 0 : index
    %c0_7 = arith.constant 0 : index
    %10 = vector.load %arg4[%c0_6, %c0_7] : memref<128x10xbf16, #tpu.memory_space<vmem>>, vector<128x10xbf16>
    %cst_8 = arith.constant dense<0.000000e+00> : vector<8x10xf32>
    %11 = tpu.matmul %9, %10, %cst_8 {dimension_numbers = #tpu.dot_dimension_numbers<[1], [0], [0], [1], [0, 0, 1, 1], [], []>} : vector<8x128xbf16>, vector<128x10xbf16>, vector<8x10xf32> -> vector<8x10xf32>
    %c0_9 = arith.constant 0 : index
    %c0_10 = arith.constant 0 : index
    %12 = vector.load %arg5[%c0_9, %c0_10] : memref<1x10xf32, #tpu.memory_space<vmem>>, vector<1x10xf32>
    %13 = vector.broadcast %12 : vector<1x10xf32> to vector<8x10xf32>
    %14 = arith.addf %11, %13 : vector<8x10xf32>
    %c0_11 = arith.constant 0 : index
    %c0_12 = arith.constant 0 : index
    %15 = vector.load %arg6[%c0_11, %c0_12] : memref<8x10xf32, #tpu.memory_space<vmem>>, vector<8x10xf32>
    tpu.vector_store %arg6[%c0_11, %c0_12], %14 {strides = array<i32>} : memref<8x10xf32, #tpu.memory_space<vmem>>, vector<8x10xf32>,
    return
  }
  func.func @transform_0(%arg0: i32) -> (i32, i32) {
    %c0_i32 = arith.constant 0 : i32
    %c0_i32_0 = arith.constant 0 : i32
    return %arg0, %c0_i32 : i32, i32
  }
  func.func @transform_1(%arg0: i32) -> (i32, i32) {
    %c0_i32 = arith.constant 0 : i32
    %c0_i32_0 = arith.constant 0 : i32
    %c0_i32_1 = arith.constant 0 : i32
    return %c0_i32, %c0_i32_0 : i32, i32
  }
  func.func @transform_2(%arg0: i32) -> (i32, i32) {
    %c0_i32 = arith.constant 0 : i32
    %c0_i32_0 = arith.constant 0 : i32
    %c0_i32_1 = arith.constant 0 : i32
    return %c0_i32, %c0_i32_0 : i32, i32
  }
  func.func @transform_3(%arg0: i32) -> (i32, i32) {
    %c0_i32 = arith.constant 0 : i32
    %c0_i32_0 = arith.constant 0 : i32
    %c0_i32_1 = arith.constant 0 : i32
    return %c0_i32, %c0_i32_0 : i32, i32
  }
  func.func @transform_4(%arg0: i32) -> (i32, i32) {
    %c0_i32 = arith.constant 0 : i32
    %c0_i32_0 = arith.constant 0 : i32
    %c0_i32_1 = arith.constant 0 : i32
    return %c0_i32, %c0_i32_0 : i32, i32
  }
  func.func @transform_5(%arg0: i32) -> (i32, i32) {
    %c0_i32 = arith.constant 0 : i32
    %c0_i32_0 = arith.constant 0 : i32
    return %arg0, %c0_i32 : i32, i32
  }
}

</mosaic_0001>

<bundles_post_ra>
// kernel: simple_nn_forward.1
= control target key start
LH: loop header
LB: loop body
LE: loop exit
PB: predicated region body
PF: predicated region fallthrough
CT: control target
= control target key end

     0   :  { %10 = vsyncpa [#allocation3], 0  ;;  %s979_s18 = smov [#allocation2]   ;;  %s1084_s0 = inlined_call_operand.vmem [shape: f32[8,784], index: 0, kind: input, shape index: {}]   ;;  %s1085_s1 = inlined_call_operand.hbm [shape: bf16[784,128], index: 1, kind: input, shape index: {}]   ;;  %s1086_s2 = inlined_call_operand.vmem [shape: f32[1,128], index: 2, kind: input, shape index: {}]   ;;  %s1087_s3 = inlined_call_operand.vmem [shape: bf16[128,10], index: 3, kind: input, shape index: {}]   ;;  %s1088_s4 = inlined_call_operand.vmem [shape: f32[1,10], index: 4, kind: input, shape index: {}]   ;;  %s1089_s5 = inlined_call_operand.vmem [shape: f32[8,10], index: 5, kind: output, shape index: {}]  }
   0x1   :  { %s18_s19 = sshll.u32 %s979_s18, 4  ;;  %s19_s19 = int_to_ptr.vmem [resolvable:$true] %s18_s19 }
   0x2   :  { %s965_s20 = scalar_lea.vmem %s19_s19, 6272  ;;  %p970_p1 = scmp.lt.s32.totalorder %s19_s19, %s19_s19 }
   0x3   :  { %p966_p0 = scmp.ne.s32.totalorder %s19_s19, %s965_s20  ;;  %p971_p2 = scmp.lt.s32.totalorder %s965_s20, %s965_s20 }
   0x5   :  { %p972_p3 = por %p971_p2, %p970_p1 }
   0x7   :  { %p973_p4 = pnand %p972_p3, %p966_p0 }
   0x9   :  { %976 = shalt.err (!%p973_p4)
}
   0xa   :  { %s980_s21 = smov 64   ;;  %s981_s22 = smov 4  }
   0xb   :  { %24 = dma.hbm_to_vmem [thread:$0]  %s1085_s1, 6272, %s19_s19, [#allocation3], %s980_s21, %s980_s21, %s981_s22  }
   0xc   :  { %977 = dma.done.wait [#allocation3], 6272  }
   0xd   :  { %978 = vsyncadd [#allocation3], 4294961024  ;;  %v900_v0 = vld [vmem:[#allocation2 + $0x78] sm:$0xff]   ;;  %v904_v4 = vld [vmem:[#allocation2 + $0x70] sm:$0xff]   ;;  %v982_v44 = vmov 0.0   ;;  %vm983_vm0 = vmmov 0  }
   0xe   :  { %v901_v1 = vld [vmem:[#allocation2 + $0x38] sm:$0xff]   ;;  %792 = vmatprep.subr.bf16.mxu0 %v900_v0  ;;  %v905_v5 = vld [vmem:[#allocation2 + $0x30] sm:$0xff]   ;;  %v908_v8 = vld [vmem:[#allocation2 + $0x68] sm:$0xff]   ;;  %vm448_vm1 = vcmask 130048   ;;  %vm725_vm2 = vcmask 80896  }
   0xf   :  { %v902_v2 = vld [vmem:[#allocation2 + $0xf8] sm:$0xff]   ;;  %793 = vmatpush3.bf16.msra.mxu0 %v901_v1  ;;  %v906_v6 = vld [vmem:[#allocation2 + $0xf0] sm:$0xff]   ;;  %v909_v9 = vld [vmem:[#allocation2 + $0x28] sm:$0xff]  }
  0x10   :  { %v903_v3 = vld [vmem:[#allocation2 + $0xb8] sm:$0xff]   ;;  %814 = vmatprep.subr.bf16.mxu1 %v902_v2  ;;  %794 = vmatprep.subr.bf16.mxu0 %v904_v4  ;;  %v907_v7 = vld [vmem:[#allocation2 + $0xb0] sm:$0xff]   ;;  %v910_v10 = vld [vmem:[#allocation2 + $0xe8] sm:$0xff]  }
  0x11   :  { %815 = vmatpush3.bf16.msra.mxu1 %v903_v3  ;;  %v911_v11 = vld [vmem:[#allocation2 + $0xa8] sm:$0xff]   ;;  %v912_v12 = vld [vmem:[#allocation2 + $0x60] sm:$0xff]   ;;  %v916_v16 = vld [vmem:[#allocation2 + $0x58] sm:$0xff]  }
  0x12   :  { %816 = vmatprep.subr.bf16.mxu1 %v906_v6  ;;  %v913_v13 = vld [vmem:[#allocation2 + $0x20] sm:$0xff]   ;;  %v917_v17 = vld [vmem:[#allocation2 + $0x18] sm:$0xff]   ;;  %v920_v20 = vld [vmem:[#allocation2 + $0x50] sm:$0xff]  }
  0x13   :  { %795 = vmatpush3.bf16.msra.mxu0 %v905_v5  ;;  %v914_v14 = vld [vmem:[#allocation2 + $0xe0] sm:$0xff]   ;;  %v918_v18 = vld [vmem:[#allocation2 + $0xd8] sm:$0xff]   ;;  %v921_v21 = vld [vmem:[#allocation2 + $0x10] sm:$0xff]  }
  0x14   :  { %796 = vmatprep.subr.bf16.mxu0 %v908_v8  ;;  %v915_v15 = vld [vmem:[#allocation2 + $0xa0] sm:$0xff]   ;;  %v919_v19 = vld [vmem:[#allocation2 + $0x98] sm:$0xff]   ;;  %v922_v22 = vld [vmem:[#allocation2 + $0xd0] sm:$0xff]  }
  0x15   :  { %817 = vmatpush3.bf16.msra.mxu1 %v907_v7  ;;  %v923_v23 = vld [vmem:[#allocation2 + $0x90] sm:$0xff]   ;;  %v924_v24 = vld [vmem:[#allocation2 + $0x48] sm:$0xff]   ;;  %v928_v28 = vld [vmem:[#allocation2 + $0x40] sm:$0xff]  }
  0x16   :  { %818 = vmatprep.subr.bf16.mxu1 %v910_v10  ;;  %v925_v25 = vld [vmem:[#allocation2 + $0x8] sm:$0xff]   ;;  %v929_v29 = vld [vmem:[#allocation2] sm:$0xff]   ;;  %v932_v36 = vld [vmem:[#allocation2 + $0x178] sm:$0xff]  }
  0x17   :  { %797 = vmatpush3.bf16.msra.mxu0 %v909_v9  ;;  %v926_v26 = vld [vmem:[#allocation2 + $0xc8] sm:$0xff]   ;;  %v930_v30 = vld [vmem:[#allocation2 + $0xc0] sm:$0xff]   ;;  %v38_v37 = vld [vmem:[%s1084_s0 + $0x18] sm:$0xff] }
  0x18   :  { %798 = vmatprep.subr.bf16.mxu0 %v912_v12  ;;  %v927_v27 = vld [vmem:[#allocation2 + $0x88] sm:$0xff]   ;;  %v931_v33 = vld [vmem:[#allocation2 + $0x80] sm:$0xff]   ;;  %v45_v38 = vpack.c.bf16 %v38_v37, %v38_v37  ;;  %v933_v39 = vld [vmem:[#allocation2 + $0x138] sm:$0xff]  }
  0x19   :  { %819 = vmatpush3.bf16.msra.mxu1 %v911_v11  ;;  %v36_v31 = vld [vmem:[%s1084_s0 + $0x8] sm:$0xff]  ;;  %v35_v34 = vld [vmem:[%s1084_s0] sm:$0xff]  ;;  %v37_v40 = vld [vmem:[%s1084_s0 + $0x10] sm:$0xff] }
  0x1a   :  { %820 = vmatprep.subr.bf16.mxu1 %v914_v14  ;;  %v43_v32 = vpack.c.bf16 %v36_v31, %v36_v31  ;;  %v42_v35 = vpack.c.bf16 %v35_v34, %v35_v34  ;;  %524 = vmatprep.mubr.bf16.mxu1 %v45_v38  ;;  %v44_v41 = vpack.c.bf16 %v37_v40, %v37_v40  ;;  %v934_v42 = vld [vmem:[#allocation2 + $0x170] sm:$0xff]   ;;  %v936_v45 = vld [vmem:[#allocation2 + $0x168] sm:$0xff]   ;;  %v938_v47 = vld [vmem:[#allocation2 + $0x160] sm:$0xff]  }
  0x1b   :  { %799 = vmatpush3.bf16.msra.mxu0 %v913_v13  ;;  %v935_v43 = vld [vmem:[#allocation2 + $0x130] sm:$0xff]   ;;  %v937_v46 = vld [vmem:[#allocation2 + $0x128] sm:$0xff]   ;;  %v939_v48 = vld [vmem:[#allocation2 + $0x120] sm:$0xff]  }
  0x1c   :  { %800 = vmatprep.subr.bf16.mxu0 %v916_v16  ;;  %484 = vmatprep.mubr.bf16.mxu0 %v43_v32  ;;  %v940_v49 = vld [vmem:[#allocation2 + $0x158] sm:$0xff]   ;;  %v942_v51 = vld [vmem:[#allocation2 + $0x150] sm:$0xff]   ;;  %v948_v53 = vld [vmem:[#allocation2 + $0x180] sm:$0xff]  }
  0x1d   :  { %821 = vmatpush3.bf16.msra.mxu1 %v915_v15  ;;  %v941_v50 = vld [vmem:[#allocation2 + $0x118] sm:$0xff]   ;;  %v943_v52 = vld [vmem:[#allocation2 + $0x110] sm:$0xff]   ;;  %v40_v54 = vld [vmem:[%s1084_s0 + $0x28] sm:$0xff] }
  0x1e   :  { %822 = vmatprep.subr.bf16.mxu1 %v918_v18  ;;  %v944_v55 = vld [vmem:[#allocation2 + $0x148] sm:$0xff]   ;;  %v47_v56 = vpack.c.bf16 %v40_v54, %v40_v54  ;;  %v41_v57 = vld [vmem:[%s1084_s0 + $0x30] sm:$0xff]  ;;  %v946_v60 = vld [vmem:[#allocation2 + $0x140] sm:$0xff]  }
  0x1f   :  { %801 = vmatpush3.bf16.msra.mxu0 %v917_v17  ;;  %v48_v58 = vpack.c.bf16 %v41_v57, %v41_v57  ;;  %v945_v59 = vld [vmem:[#allocation2 + $0x108] sm:$0xff]   ;;  %v947_v61 = vld [vmem:[#allocation2 + $0x100] sm:$0xff]   ;;  %v949_v0 = vld [vmem:[%s1087_s3 + $0x38] sm:$0xff]  }
  0x20   :  { %802 = vmatprep.subr.bf16.mxu0 %v920_v20  ;;  %v39_v62 = vld [vmem:[%s1084_s0 + $0x20] sm:$0xff]  ;;  %v950_v1 = vld [vmem:[%s1087_s3 + $0x30] sm:$0xff]   ;;  %v951_v2 = vld [vmem:[%s1087_s3 + $0x28] sm:$0xff]  }
  0x21   :  { %823 = vmatpush3.bf16.msra.mxu1 %v919_v19  ;;  %v46_v63 = vpack.c.bf16 %v39_v62, %v39_v62  ;;  %v952_v3 = vld [vmem:[%s1087_s3 + $0x20] sm:$0xff]   ;;  %v953_v4 = vld [vmem:[%s1087_s3 + $0x18] sm:$0xff]   ;;  %v954_v5 = vld [vmem:[%s1087_s3 + $0x10] sm:$0xff]  }
  0x22   :  { %824 = vmatprep.subr.bf16.mxu1 %v922_v22  ;;  %v955_v6 = vld [vmem:[%s1087_s3 + $0x8] sm:$0xff]   ;;  %v956_v7 = vld [vmem:[%s1087_s3] sm:$0xff]  }
  0x23   :  { %803 = vmatpush3.bf16.msra.mxu0 %v921_v21  ;;  %v732_v21 = vld [vmem:[%s1086_s2] ss:$0 sm:$0xff] }
  0x24   :  { %804 = vmatprep.subr.bf16.mxu0 %v924_v24  ;;  %v783_v34 = vld [vmem:[%s1088_s4] ss:$0 sm:$0xff] }
  0x25   :  { %825 = vmatpush3.bf16.msra.mxu1 %v923_v23 }
  0x26   :  { %826 = vmatprep.subr.bf16.mxu1 %v926_v26 }
  0x27   :  { %805 = vmatpush3.bf16.msra.mxu0 %v925_v25 }
  0x28   :  { %806 = vmatprep.subr.bf16.mxu0 %v928_v28 }
  0x29   :  { %827 = vmatpush3.bf16.msra.mxu1 %v927_v27 }
  0x2a   :  { %828 = vmatprep.subr.bf16.mxu1 %v930_v30 }
  0x2b   :  { %807 = vmatpush3.bf16.msra.mxu0 %v929_v29 }
  0x2c   :  { %836 = vmatprep.subr.bf16.mxu0 %v932_v36 }
  0x2d   :  { %829 = vmatpush3.bf16.msra.mxu1 %v931_v33 }
  0x2e   :  { %485 = vmatmul.mubr.bf16.vlgmr.msra.gmra.mxu0 %v42_v35  ;;  %869 = vmatprep.subr.bf16.mxu1 %v982_v44 }
  0x2f   :  { %837 = vmatpush3.bf16.msra.mxu0 %v933_v39  ;;  %564 = vmatprep.mubr.bf16.mxu0 %v47_v56 }
  0x30   :  { %525 = vmatmul.mubr.bf16.vlgmr.msra.gmra.mxu1 %v44_v41  ;;  %838 = vmatprep.subr.bf16.mxu0 %v934_v42 }
  0x31   :  { %871 = vmatprep.mubr.msk.bf16.mxu1 %vm983_vm0, %v982_v44  ;;  %870 = vmatpush3.bf16.msra.mxu1 %v948_v53 }
  0x32   :  { %875 = vmatprep.subr.bf16.mxu1 %v982_v44 }
  0x33   :  { %839 = vmatpush3.bf16.msra.mxu0 %v935_v43 }
  0x34   :  { %840 = vmatprep.subr.bf16.mxu0 %v936_v45 }
  0x37   :  { %841 = vmatpush3.bf16.msra.mxu0 %v937_v46 }
  0x38   :  { %842 = vmatprep.subr.bf16.mxu0 %v938_v47  ;;  %872 = vmatmul.mubr.msk.bf16.vlgmr.msra.gmra.mxu1 %vm448_vm1, %v48_v58 }
  0x39   :  { %891 = vmatprep.mubr.msk.bf16.mxu1 %vm983_vm0, %v982_v44  ;;  %876 = vmatpush3.bf16.msra.mxu1 %v949_v0 }
  0x3a   :  { %877 = vmatprep.subr.bf16.mxu1 %v982_v44 }
  0x3b   :  { %843 = vmatpush3.bf16.msra.mxu0 %v939_v48 }
  0x3c   :  { %844 = vmatprep.subr.bf16.mxu0 %v940_v49 }
  0x3d   :  { %878 = vmatpush3.bf16.msra.mxu1 %v950_v1 }
  0x3e   :  { %879 = vmatprep.subr.bf16.mxu1 %v982_v44 }
  0x3f   :  { %845 = vmatpush3.bf16.msra.mxu0 %v941_v50 }
  0x40   :  { %846 = vmatprep.subr.bf16.mxu0 %v942_v51 }
  0x41   :  { %880 = vmatpush3.bf16.msra.mxu1 %v951_v2 }
  0x42   :  { %881 = vmatprep.subr.bf16.mxu1 %v982_v44 }
  0x43   :  { %847 = vmatpush3.bf16.msra.mxu0 %v943_v52 }
  0x44   :  { %848 = vmatprep.subr.bf16.mxu0 %v944_v55 }
  0x45   :  { %882 = vmatpush3.bf16.msra.mxu1 %v952_v3 }
  0x46   :  { %883 = vmatprep.subr.bf16.mxu1 %v982_v44 }
  0x47   :  { %849 = vmatpush3.bf16.msra.mxu0 %v945_v59 }
  0x48   :  { %850 = vmatprep.subr.bf16.mxu0 %v946_v60 }
  0x49   :  { %884 = vmatpush3.bf16.msra.mxu1 %v953_v4 }
  0x4a   :  { %885 = vmatprep.subr.bf16.mxu1 %v982_v44 }
  0x4b   :  { %851 = vmatpush3.bf16.msra.mxu0 %v947_v61 }
  0x4d   :  { %886 = vmatpush3.bf16.msra.mxu1 %v954_v5 }
  0x4e   :  { %565 = vmatmul.mubr.bf16.vlgmr.msra.gmra.mxu0 %v46_v63  ;;  %887 = vmatprep.subr.bf16.mxu1 %v982_v44 }
  0x51   :  { %888 = vmatpush3.bf16.msra.mxu1 %v955_v6 }
  0x52   :  { %889 = vmatprep.subr.bf16.mxu1 %v982_v44 }
  0x55   :  { %890 = vmatpush3.bf16.msra.mxu1 %v956_v7 }
  0xee   :  { %v808_v8 = vpop.f32.mrf.mxu0 }
  0xf0   :  { %v809_v9 = vpop.f32.mrf.mxu0  ;;  %v830_v10 = vpop.f32.mrf.mxu1 }
  0xf1   :  { %v810_v20 = vadd.f32 %v809_v9, %v808_v8 }
  0xf2   :  { %v811_v11 = vpop.f32.mrf.mxu0  ;;  %v831_v12 = vpop.f32.mrf.mxu1 }
  0xf3   :  { %v487_v22 = vadd.f32 %v810_v20, %v732_v21  ;;  %v832_v23 = vadd.f32 %v831_v12, %v830_v10 }
  0xf4   :  { %v812_v13 = vpop.f32.mrf.mxu0  ;;  %v833_v14 = vpop.f32.mrf.mxu1 }
  0xf5   :  { %v527_v26 = vadd.f32 %v832_v23, %v487_v22 }
  0xf6   :  { %v834_v15 = vpop.f32.mrf.mxu1 }
  0xf8   :  { %v606_v16 = vpop.f32.mrf.mxu1 }
  0xfa   :  { %v873_v17 = vpop.f32.mrf.mxu1 }
  0xfc   :  { %v609_v18 = vpop.f32.mrf.mxu1 }
  0xfe   :  { %v874_v19 = vpop.f32.mrf.mxu1 }
 0x10e   :  { %v852_v24 = vpop.f32.mrf.mxu0 }
 0x110   :  { %v853_v25 = vpop.f32.mrf.mxu0 }
 0x111   :  { %v854_v27 = vadd.f32 %v853_v25, %v852_v24 }
 0x112   :  { %v855_v28 = vpop.f32.mrf.mxu0 }
 0x113   :  { %v567_v29 = vadd.f32 %v854_v27, %v527_v26 }
 0x114   :  { %v856_v30 = vpop.f32.mrf.mxu0 }
 0x115   :  { %v607_v31 = vadd.f32 %v606_v16, %v567_v29 }
 0x117   :  { %v612_v32 = vmax.f32 %v607_v31, 0.0 }
 0x119   :  { %v613_v33 = vpack.c.bf16 %v612_v32, %v612_v32 }
 0x11b   :  { %892 = vmatmul.mubr.bf16.vlgmr.msra.gmra.mxu1 %v613_v33 }
 0x1db   :  { %v719_v35 = vpop.f32.mrf.mxu1 }
 0x1dc   :  { %v720_v36 = vadd.f32 %v783_v34, %v719_v35 }
 0x1dd   :  { %v893_v37 = vpop.f32.mrf.mxu1 }
 0x1de   :  { %726 = vst.msk [vmem:[%s1089_s5] sm:$0xff] %vm725_vm2, %v720_v36 }
 0x1df   :  { %v722_v38 = vpop.f32.mrf.mxu1 }
 0x1e1   :  { %v894_v39 = vpop.f32.mrf.mxu1 }
 0x1e2   :  { %731 = vsyncpa [#allocation3], 1 }

</bundles_post_ra>
